<compile_context>
chip_gen: v7x
topology: tpu7x:2x2x1
jax: 0.10.0
libtpu: 0.0.40
codegen_flags: <defaults>
</compile_context>

<pallas_src>
import jax
import jax.numpy as jnp
from jax.experimental import pallas as pl
from jax.experimental.pallas import tpu as pltpu


def _round_up(x: int, m: int) -> int:
    return ((x + m - 1) // m) * m


def _mlp_kernel(z_ref, w1_ref, b1_ref, w2_ref, b2_ref, w3_ref, b3_ref, o_ref):
    # Fused 3-layer MLP on one batch tile. Matmuls accumulate in f32 on the MXU;
    # operands are in the weights' dtype (f32 or bf16), biases stay f32.
    cdt = w1_ref.dtype

    z = z_ref[...].astype(cdt)
    h1 = jnp.dot(z, w1_ref[...], preferred_element_type=jnp.float32) + b1_ref[...]
    h1 = jnp.maximum(h1, 0.0)

    h2 = jnp.dot(h1.astype(cdt), w2_ref[...], preferred_element_type=jnp.float32) + b2_ref[...]
    h2 = jnp.maximum(h2, 0.0)

    out = jnp.dot(h2.astype(cdt), w3_ref[...], preferred_element_type=jnp.float32) + b3_ref[...]
    o_ref[...] = out.astype(o_ref.dtype)


def embed_reconstructor_forward(z, params, *, block_b=2048,
                                compute_dtype=jnp.bfloat16,
                                out_dtype=jnp.float32):
    """Run the fused MLP decoder kernel.

    z:      (B, latent_dim) float32 or bfloat16 (bf16 is accepted as-is; no
            wrapper-side cast is inserted).
    params: dict with w1 (latent_dim,128), b1 (1,128),
                      w2 (128,128),        b2 (1,128),
                      w3 (128,input_dim),  b3 (1,input_dim)
    block_b:        batch tile size (rounded to a multiple of 8, clamped to the
                    batch and to ~B/2 so the grid has >= 2 steps for megacore).
    compute_dtype:  jnp.bfloat16 (default, MXU-peak on v6e/v7x, f32 accumulation)
                    or jnp.float32 (bit-faithful validation path).
    out_dtype:      output dtype (jnp.float32 default; bf16 halves writeback).
    returns (B, input_dim) out_dtype
    """
    w1, b1 = params["w1"], params["b1"]
    w2, b2 = params["w2"], params["b2"]
    w3, b3 = params["w3"], params["b3"]

    B, latent_dim = z.shape
    hidden = w1.shape[1]
    input_dim = w3.shape[1]

    # ---- MXU operand dtype (weights); biases stay f32 for exact broadcast add. ----
    w1c = w1.astype(compute_dtype)
    w2c = w2.astype(compute_dtype)
    w3c = w3.astype(compute_dtype)

    # ---- Batch tiling ----------------------------------------------------------
    # tb: multiple of 8, at most the (8-rounded) batch, and at most ~B/2 so that
    # whenever B > 8 the grid has >= 2 steps and the "parallel" B axis can be
    # sharded over v7x's 2 TensorCores. Ragged last block is handled by Pallas
    # (OOB rows of the output tile are simply not written back).
    tb = min(_round_up(block_b, 8), _round_up(B, 8))
    if B > 8:
        tb = min(tb, _round_up(pl.cdiv(B, 2), 8))
    grid = (pl.cdiv(B, tb),)

    def _nbytes(a):
        return a.size * a.dtype.itemsize

    # ---- VMEM budget (per grid step) -------------------------------------------
    #   2 x (tb, latent) z tile           (double-buffered input DMA)
    # + 2 x (tb, input_dim) out tile      (double-buffered output DMA)
    # + 2 x resident weights/biases       (constant index_map, still 2 buffers)
    # + f32 temporaries h1 (tb,128), h2 (tb,128), pre-store out (tb, input_dim)
    weight_bytes = sum(_nbytes(a) for a in (w1c, b1, w2c, b2, w3c, b3))
    est_vmem = (2 * tb * latent_dim * z.dtype.itemsize
                + 2 * tb * input_dim * jnp.dtype(out_dtype).itemsize
                + 2 * weight_bytes
                + tb * (2 * hidden + input_dim) * 4)
    vmem_limit = None
    if est_vmem > 12 * 1024 * 1024:  # may exceed v5e's 16 MiB default scoped VMEM
        vmem_limit = min(64 << 20, int(est_vmem * 1.5) + (2 << 20))

    cost = pl.CostEstimate(
        flops=2 * B * (latent_dim * hidden + hidden * hidden + hidden * input_dim),
        transcendentals=0,
        bytes_accessed=(_nbytes(z) + weight_bytes
                        + B * input_dim * jnp.dtype(out_dtype).itemsize),
    )

    # Resident operands: constant index_map -> DMA'd once, stay in VMEM.
    # TODO(synk): once pipeline_mode=pl.Buffered(1) is verified on the target
    # JAX build, single-buffer these to reclaim ~weight_bytes of VMEM headroom.
    const = lambda shape: pl.BlockSpec(shape, lambda i: (0, 0))

    out = pl.pallas_call(
        _mlp_kernel,
        out_shape=jax.ShapeDtypeStruct((B, input_dim), out_dtype),
        grid_spec=pl.GridSpec(
            grid=grid,
            in_specs=[
                pl.BlockSpec((tb, latent_dim), lambda i: (i, 0)),  # z: tiled over B
                const(w1c.shape), const(b1.shape),
                const(w2c.shape), const(b2.shape),
                const(w3c.shape), const(b3.shape),
            ],
            out_specs=pl.BlockSpec((tb, input_dim), lambda i: (i, 0)),
        ),
        compiler_params=pltpu.CompilerParams(
            dimension_semantics=("parallel",),   # shard B across TCs on v7x
            vmem_limit_bytes=vmem_limit,
        ),
        cost_estimate=cost,
    )(z, w1c, b1, w2c, b2, w3c, b3)

    return out


def init_params(key, latent_dim, input_dim, hidden=128):
    """Deterministic init mimicking PyTorch nn.Linear default
    (U[-1/sqrt(fan_in), 1/sqrt(fan_in)]). Weights stored as (in, out)."""
    ks = jax.random.split(key, 6)

    def lin(kw, kb, fan_in, fan_out):
        bound = 1.0 / jnp.sqrt(jnp.float32(fan_in))
        w = jax.random.uniform(kw, (fan_in, fan_out), jnp.float32, -bound, bound)
        b = jax.random.uniform(kb, (1, fan_out), jnp.float32, -bound, bound)
        return w, b

    w1, b1 = lin(ks[0], ks[1], latent_dim, hidden)
    w2, b2 = lin(ks[2], ks[3], hidden, hidden)
    w3, b3 = lin(ks[4], ks[5], hidden, input_dim)
    return {"w1": w1, "b1": b1, "w2": w2, "b2": b2, "w3": w3, "b3": b3}


def _reference_forward(z, params):
    h1 = jnp.maximum(z @ params["w1"] + params["b1"], 0.0)
    h2 = jnp.maximum(h1 @ params["w2"] + params["b2"], 0.0)
    return h2 @ params["w3"] + params["b3"]


if __name__ == "__main__":
    key = jax.random.PRNGKey(0)
    k_z, k_p, k_z2 = jax.random.split(key, 3)

    latent_dim, input_dim = 32, 64
    params = init_params(k_p, latent_dim, input_dim)

    # 1) Small batch, f32 validation path, single grid step.
    batch = 8
    z = jax.random.normal(k_z, (batch, latent_dim), jnp.float32)
    out = jax.block_until_ready(
        embed_reconstructor_forward(z, params, compute_dtype=jnp.float32))
    ref = _reference_forward(z, params)
    assert out.shape == (batch, input_dim)
    assert jnp.allclose(out, ref, atol=1e-4, rtol=1e-4)

    # 2) Ragged batch (B=300) exercising a multi-step grid with a masked partial
    #    last block (no wrapper pad / slice), f32 path.
    batch2 = 300
    z2 = jax.random.normal(k_z2, (batch2, latent_dim), jnp.float32)
    out2 = jax.block_until_ready(
        embed_reconstructor_forward(z2, params, block_b=128,
                                    compute_dtype=jnp.float32))
    ref2 = _reference_forward(z2, params)
    assert out2.shape == (batch2, input_dim)
    assert jnp.allclose(out2, ref2, atol=1e-4, rtol=1e-4)

    # 3) Default path: bf16 MXU operands (f32 accumulation), tb capped to ~B/2
    #    so the grid has 2 steps — looser tolerance expected.
    out3 = jax.block_until_ready(embed_reconstructor_forward(z2, params))
    assert out3.shape == (batch2, input_dim)
    assert jnp.allclose(out3, ref2, atol=5e-2, rtol=5e-2)

    # 4) bf16 z accepted directly + bf16 output (halved read and writeback).
    z2_bf16 = z2.astype(jnp.bfloat16)
    out4 = jax.block_until_ready(
        embed_reconstructor_forward(z2_bf16, params, out_dtype=jnp.bfloat16))
    assert out4.shape == (batch2, input_dim)
    assert out4.dtype == jnp.bfloat16
    assert jnp.allclose(out4.astype(jnp.float32), ref2, atol=1.5e-1, rtol=1e-1)

    print("KERNEL_OK")
</pallas_src>

<mosaic_0001>
module attributes {stable_mosaic.version = 11 : i64} {
  func.func @_mlp_kernel(%arg0: i32, %arg1: memref<8x32xf32, #tpu.memory_space<vmem>>, %arg2: memref<32x128xf32, #tpu.memory_space<vmem>>, %arg3: memref<1x128xf32, #tpu.memory_space<vmem>>, %arg4: memref<128x128xf32, #tpu.memory_space<vmem>>, %arg5: memref<1x128xf32, #tpu.memory_space<vmem>>, %arg6: memref<128x64xf32, #tpu.memory_space<vmem>>, %arg7: memref<1x64xf32, #tpu.memory_space<vmem>>, %arg8: memref<8x64xf32, #tpu.memory_space<vmem>>) attributes {dimension_semantics = [#tpu.dimension_semantics<parallel>], iteration_bounds = array<i64: 1>, scalar_prefetch = 0 : i64, scratch_operands = 0 : i64, tpu.core_type = #tpu.core_type<tc>, window_params = [{transform_indices = @transform_0, window_bounds = array<i64: 8, 32>}, {pipeline_mode = #tpu.pipeline_mode<synchronous>, transform_indices = @transform_1, window_bounds = array<i64: 32, 128>}, {pipeline_mode = #tpu.pipeline_mode<synchronous>, transform_indices = @transform_2, window_bounds = array<i64: 1, 128>}, {pipeline_mode = #tpu.pipeline_mode<synchronous>, transform_indices = @transform_3, window_bounds = array<i64: 128, 128>}, {pipeline_mode = #tpu.pipeline_mode<synchronous>, transform_indices = @transform_4, window_bounds = array<i64: 1, 128>}, {pipeline_mode = #tpu.pipeline_mode<synchronous>, transform_indices = @transform_5, window_bounds = array<i64: 128, 64>}, {pipeline_mode = #tpu.pipeline_mode<synchronous>, transform_indices = @transform_6, window_bounds = array<i64: 1, 64>}, {transform_indices = @transform_7, window_bounds = array<i64: 8, 64>}]} {
    %c0 = arith.constant 0 : index
    %c0_0 = arith.constant 0 : index
    %0 = vector.load %arg1[%c0, %c0_0] : memref<8x32xf32, #tpu.memory_space<vmem>>, vector<8x32xf32>
    %c0_1 = arith.constant 0 : index
    %c0_2 = arith.constant 0 : index
    %1 = vector.load %arg2[%c0_1, %c0_2] : memref<32x128xf32, #tpu.memory_space<vmem>>, vector<32x128xf32>
    %cst = arith.constant dense<0.000000e+00> : vector<8x128xf32>
    %2 = tpu.matmul %0, %1, %cst {dimension_numbers = #tpu.dot_dimension_numbers<[1], [0], [0], [1], [0, 0, 1, 1], [], []>} : vector<8x32xf32>, vector<32x128xf32>, vector<8x128xf32> -> vector<8x128xf32>
    %c0_3 = arith.constant 0 : index
    %c0_4 = arith.constant 0 : index
    %3 = vector.load %arg3[%c0_3, %c0_4] : memref<1x128xf32, #tpu.memory_space<vmem>>, vector<1x128xf32>
    %4 = vector.broadcast %3 : vector<1x128xf32> to vector<8x128xf32>
    %5 = arith.addf %2, %4 : vector<8x128xf32>
    %cst_5 = arith.constant 0.000000e+00 : f32
    %6 = vector.broadcast %cst_5 : f32 to vector<8x128xf32>
    %7 = arith.maximumf %5, %6 : vector<8x128xf32>
    %c0_6 = arith.constant 0 : index
    %c0_7 = arith.constant 0 : index
    %8 = vector.load %arg4[%c0_6, %c0_7] : memref<128x128xf32, #tpu.memory_space<vmem>>, vector<128x128xf32>
    %cst_8 = arith.constant dense<0.000000e+00> : vector<8x128xf32>
    %9 = tpu.matmul %7, %8, %cst_8 {dimension_numbers = #tpu.dot_dimension_numbers<[1], [0], [0], [1], [0, 0, 1, 1], [], []>} : vector<8x128xf32>, vector<128x128xf32>, vector<8x128xf32> -> vector<8x128xf32>
    %c0_9 = arith.constant 0 : index
    %c0_10 = arith.constant 0 : index
    %10 = vector.load %arg5[%c0_9, %c0_10] : memref<1x128xf32, #tpu.memory_space<vmem>>, vector<1x128xf32>
    %11 = vector.broadcast %10 : vector<1x128xf32> to vector<8x128xf32>
    %12 = arith.addf %9, %11 : vector<8x128xf32>
    %cst_11 = arith.constant 0.000000e+00 : f32
    %13 = vector.broadcast %cst_11 : f32 to vector<8x128xf32>
    %14 = arith.maximumf %12, %13 : vector<8x128xf32>
    %c0_12 = arith.constant 0 : index
    %c0_13 = arith.constant 0 : index
    %15 = vector.load %arg6[%c0_12, %c0_13] : memref<128x64xf32, #tpu.memory_space<vmem>>, vector<128x64xf32>
    %cst_14 = arith.constant dense<0.000000e+00> : vector<8x64xf32>
    %16 = tpu.matmul %14, %15, %cst_14 {dimension_numbers = #tpu.dot_dimension_numbers<[1], [0], [0], [1], [0, 0, 1, 1], [], []>} : vector<8x128xf32>, vector<128x64xf32>, vector<8x64xf32> -> vector<8x64xf32>
    %c0_15 = arith.constant 0 : index
    %c0_16 = arith.constant 0 : index
    %17 = vector.load %arg7[%c0_15, %c0_16] : memref<1x64xf32, #tpu.memory_space<vmem>>, vector<1x64xf32>
    %18 = vector.broadcast %17 : vector<1x64xf32> to vector<8x64xf32>
    %19 = arith.addf %16, %18 : vector<8x64xf32>
    %c0_17 = arith.constant 0 : index
    %c0_18 = arith.constant 0 : index
    %20 = vector.load %arg8[%c0_17, %c0_18] : memref<8x64xf32, #tpu.memory_space<vmem>>, vector<8x64xf32>
    tpu.vector_store %arg8[%c0_17, %c0_18], %19 {strides = array<i32>} : memref<8x64xf32, #tpu.memory_space<vmem>>, vector<8x64xf32>,
    return
  }
  func.func @transform_0(%arg0: i32) -> (i32, i32) {
    %c0_i32 = arith.constant 0 : i32
    %c0_i32_0 = arith.constant 0 : i32
    return %arg0, %c0_i32 : i32, i32
  }
  func.func @transform_1(%arg0: i32) -> (i32, i32) {
    %c0_i32 = arith.constant 0 : i32
    %c0_i32_0 = arith.constant 0 : i32
    %c0_i32_1 = arith.constant 0 : i32
    return %c0_i32, %c0_i32_0 : i32, i32
  }
  func.func @transform_2(%arg0: i32) -> (i32, i32) {
    %c0_i32 = arith.constant 0 : i32
    %c0_i32_0 = arith.constant 0 : i32
    %c0_i32_1 = arith.constant 0 : i32
    return %c0_i32, %c0_i32_0 : i32, i32
  }
  func.func @transform_3(%arg0: i32) -> (i32, i32) {
    %c0_i32 = arith.constant 0 : i32
    %c0_i32_0 = arith.constant 0 : i32
    %c0_i32_1 = arith.constant 0 : i32
    return %c0_i32, %c0_i32_0 : i32, i32
  }
  func.func @transform_4(%arg0: i32) -> (i32, i32) {
    %c0_i32 = arith.constant 0 : i32
    %c0_i32_0 = arith.constant 0 : i32
    %c0_i32_1 = arith.constant 0 : i32
    return %c0_i32, %c0_i32_0 : i32, i32
  }
  func.func @transform_5(%arg0: i32) -> (i32, i32) {
    %c0_i32 = arith.constant 0 : i32
    %c0_i32_0 = arith.constant 0 : i32
    %c0_i32_1 = arith.constant 0 : i32
    return %c0_i32, %c0_i32_0 : i32, i32
  }
  func.func @transform_6(%arg0: i32) -> (i32, i32) {
    %c0_i32 = arith.constant 0 : i32
    %c0_i32_0 = arith.constant 0 : i32
    %c0_i32_1 = arith.constant 0 : i32
    return %c0_i32, %c0_i32_0 : i32, i32
  }
  func.func @transform_7(%arg0: i32) -> (i32, i32) {
    %c0_i32 = arith.constant 0 : i32
    %c0_i32_0 = arith.constant 0 : i32
    return %arg0, %c0_i32 : i32, i32
  }
}

</mosaic_0001>

<bundles_post_ra>
// kernel: tpu_custom_call.1
= control target key start
LH: loop header
LB: loop body
LE: loop exit
PB: predicated region body
PF: predicated region fallthrough
CT: control target
= control target key end

     0   :  { %v523_v3 = vmov 0.0|0.0   ;;  %vm524_vm0 = vmmov 0   ;;  %v525_v6 = vmov 0.0   ;;  %s720_s0 = inlined_call_operand.vmem [shape: f32[8,32], index: 0, kind: input, shape index: {}]   ;;  %s721_s1 = inlined_call_operand.vmem [shape: f32[32,128], index: 1, kind: input, shape index: {}]   ;;  %s722_s2 = inlined_call_operand.vmem [shape: f32[1,128], index: 2, kind: input, shape index: {}]   ;;  %s723_s3 = inlined_call_operand.vmem [shape: f32[128,128], index: 3, kind: input, shape index: {}]   ;;  %s724_s4 = inlined_call_operand.vmem [shape: f32[1,128], index: 4, kind: input, shape index: {}]   ;;  %s725_s5 = inlined_call_operand.vmem [shape: f32[128,64], index: 5, kind: input, shape index: {}]   ;;  %s726_s6 = inlined_call_operand.vmem [shape: f32[1,64], index: 6, kind: input, shape index: {}]   ;;  %s727_s7 = inlined_call_operand.hbm [shape: f32[8,64], index: 7, kind: output, shape index: {}]  }
   0x1   :  { %v28_v0 = vld [vmem:[%s721_s1] sm:$0xff]  ;;  %v29_v1 = vld [vmem:[%s721_s1 + $0x8] sm:$0xff]  ;;  %v30_v2 = vld [vmem:[%s721_s1 + $0x10] sm:$0xff]  ;;  %441 = vmatprep.subr.bf16.mxu0 %v523_v3  ;;  %368 = vmatprep.mubr.msk.f32.mxu0 %vm524_vm0, %v525_v6 }
   0x2   :  { %v442_v4 = vpack.c.bf16 %v29_v1, %v28_v0  ;;  %v31_v5 = vld [vmem:[%s721_s1 + $0x18] sm:$0xff]  ;;  %v114_v7 = vld [vmem:[%s723_s3] sm:$0xff]  ;;  %447 = vmatprep.subr.bf16.mxu1 %v523_v3  ;;  %v115_v8 = vld [vmem:[%s723_s3 + $0x8] sm:$0xff]  ;;  %403 = vmatprep.mubr.msk.f32.mxu1 %vm524_vm0, %v525_v6 }
   0x3   :  { %v116_v9 = vld [vmem:[%s723_s3 + $0x10] sm:$0xff]  ;;  %v117_v10 = vld [vmem:[%s723_s3 + $0x18] sm:$0xff]  ;;  %v445_v11 = vpack.c.bf16 %v31_v5, %v30_v2  ;;  %v448_v12 = vpack.c.bf16 %v115_v8, %v114_v7  ;;  %v118_v14 = vld [vmem:[%s723_s3 + $0x20] sm:$0xff] }
   0x4   :  { %443 = vmatpush3.bf16.msra.mxu0 %v442_v4  ;;  %v451_v13 = vpack.c.bf16 %v117_v10, %v116_v9  ;;  %v119_v15 = vld [vmem:[%s723_s3 + $0x28] sm:$0xff] }
   0x5   :  { %444 = vmatprep.subr.bf16.mxu0 %v523_v3  ;;  %449 = vmatpush3.bf16.msra.mxu1 %v448_v12 }
   0x6   :  { %450 = vmatprep.subr.bf16.mxu1 %v523_v3 }
   0x7   :  { %12 = vsyncpa [#allocation3], 0  ;;  %v27_v16 = vld [vmem:[%s720_s0] sm:$0xff]  ;;  %vm39_vm1 = vcmask 261120   ;;  %v454_v17 = vpack.c.bf16 %v119_v15, %v118_v14  ;;  %v120_v18 = vld [vmem:[%s723_s3 + $0x30] sm:$0xff]  ;;  %s526_s26 = smov [#allocation2]  }
   0x8   :  { %446 = vmatpush3.bf16.msra.mxu0 %v445_v11  ;;  %v121_v19 = vld [vmem:[%s723_s3 + $0x38] sm:$0xff]  ;;  %v122_v21 = vld [vmem:[%s723_s3 + $0x40] sm:$0xff]  ;;  %v123_v22 = vld [vmem:[%s723_s3 + $0x48] sm:$0xff]  ;;  %s309_s27 = sshll.u32 %s526_s26, 4  ;;  %vm301_vm2 = vcmask 523264   ;;  %s310_s27 = int_to_ptr.vmem [resolvable:$true] %s309_s27 }
   0x9   :  { %471 = vmatprep.subr.bf16.mxu0 %v523_v3  ;;  %452 = vmatpush3.bf16.msra.mxu1 %v451_v13  ;;  %v457_v20 = vpack.c.bf16 %v121_v19, %v120_v18  ;;  %v460_v23 = vpack.c.bf16 %v123_v22, %v122_v21  ;;  %v124_v24 = vld [vmem:[%s723_s3 + $0x50] sm:$0xff]  ;;  %v125_v25 = vld [vmem:[%s723_s3 + $0x58] sm:$0xff]  ;;  %v126_v27 = vld [vmem:[%s723_s3 + $0x60] sm:$0xff]  ;;  %p504_p1 = scmp.lt.s32.totalorder %s310_s27, %s310_s27 }
   0xa   :  { %453 = vmatprep.subr.bf16.mxu1 %v523_v3  ;;  %v463_v26 = vpack.c.bf16 %v125_v25, %v124_v24  ;;  %v127_v28 = vld [vmem:[%s723_s3 + $0x68] sm:$0xff]  ;;  %v128_v30 = vld [vmem:[%s723_s3 + $0x70] sm:$0xff]  ;;  %v129_v31 = vld [vmem:[%s723_s3 + $0x78] sm:$0xff] }
   0xb   :  { %369 = vmatmul.mubr.msk.f32.vlgmr.msra.gmra.mrb[0].mxu0 %vm39_vm1, %v27_v16  ;;  %v466_v29 = vpack.c.bf16 %v127_v28, %v126_v27  ;;  %v469_v32 = vpack.c.bf16 %v129_v31, %v128_v30  ;;  %v208_v33 = vld [vmem:[%s725_s5] sm:$0xff]  ;;  %v209_v34 = vld [vmem:[%s725_s5 + $0x8] sm:$0xff]  ;;  %v210_v35 = vld [vmem:[%s725_s5 + $0x10] sm:$0xff] }
   0xc   :  { %438 = vmatprep.mubr.msk.f32.mxu0 %vm524_vm0, %v525_v6  ;;  %v472_v36 = vpack.c.bf16 %v209_v34, %v208_v33  ;;  %v211_v37 = vld [vmem:[%s725_s5 + $0x18] sm:$0xff]  ;;  %v212_v39 = vld [vmem:[%s725_s5 + $0x20] sm:$0xff]  ;;  %v213_v40 = vld [vmem:[%s725_s5 + $0x28] sm:$0xff] }
   0xd   :  { %455 = vmatpush3.bf16.msra.mxu1 %v454_v17  ;;  %v475_v38 = vpack.c.bf16 %v211_v37, %v210_v35  ;;  %v478_v41 = vpack.c.bf16 %v213_v40, %v212_v39  ;;  %v214_v42 = vld [vmem:[%s725_s5 + $0x30] sm:$0xff]  ;;  %v215_v43 = vld [vmem:[%s725_s5 + $0x38] sm:$0xff]  ;;  %v216_v45 = vld [vmem:[%s725_s5 + $0x40] sm:$0xff] }
   0xe   :  { %456 = vmatprep.subr.bf16.mxu1 %v523_v3  ;;  %473 = vmatpush3.bf16.msra.mxu0 %v472_v36  ;;  %v481_v44 = vpack.c.bf16 %v215_v43, %v214_v42  ;;  %v217_v46 = vld [vmem:[%s725_s5 + $0x48] sm:$0xff]  ;;  %v218_v48 = vld [vmem:[%s725_s5 + $0x50] sm:$0xff]  ;;  %v219_v49 = vld [vmem:[%s725_s5 + $0x58] sm:$0xff] }
   0xf   :  { %474 = vmatprep.subr.bf16.mxu0 %v523_v3  ;;  %v484_v47 = vpack.c.bf16 %v217_v46, %v216_v45  ;;  %v487_v50 = vpack.c.bf16 %v219_v49, %v218_v48  ;;  %v220_v51 = vld [vmem:[%s725_s5 + $0x60] sm:$0xff]  ;;  %v221_v52 = vld [vmem:[%s725_s5 + $0x68] sm:$0xff]  ;;  %v222_v59 = vld [vmem:[%s725_s5 + $0x70] sm:$0xff] }
  0x10   :  { %v490_v53 = vpack.c.bf16 %v221_v52, %v220_v51  ;;  %v317_v54 = vld [vmem:[%s722_s2] ss:$0 sm:$0xff]  ;;  %v223_v60 = vld [vmem:[%s725_s5 + $0x78] sm:$0xff]  ;;  %s499_s5 = scalar_lea.vmem %s310_s27, 128 }
  0x11   :  { %458 = vmatpush3.bf16.msra.mxu1 %v457_v20  ;;  %v493_v61 = vpack.c.bf16 %v223_v60, %v222_v59  ;;  %v319_v62 = vld [vmem:[%s724_s4] ss:$0 sm:$0xff]  ;;  %p500_p0 = scmp.ne.s32.totalorder %s310_s27, %s499_s5  ;;  %p505_p2 = scmp.lt.s32.totalorder %s499_s5, %s499_s5 }
  0x12   :  { %459 = vmatprep.subr.bf16.mxu1 %v523_v3  ;;  %476 = vmatpush3.bf16.msra.mxu0 %v475_v38 }
  0x13   :  { %477 = vmatprep.subr.bf16.mxu0 %v523_v3  ;;  %p506_p3 = por %p505_p2, %p504_p1 }
  0x15   :  { %461 = vmatpush3.bf16.msra.mxu1 %v460_v23  ;;  %p507_p4 = pnand %p506_p3, %p500_p0 }
  0x16   :  { %462 = vmatprep.subr.bf16.mxu1 %v523_v3  ;;  %479 = vmatpush3.bf16.msra.mxu0 %v478_v41 }
  0x17   :  { %480 = vmatprep.subr.bf16.mxu0 %v523_v3 }
  0x19   :  { %464 = vmatpush3.bf16.msra.mxu1 %v463_v26 }
  0x1a   :  { %465 = vmatprep.subr.bf16.mxu1 %v523_v3  ;;  %482 = vmatpush3.bf16.msra.mxu0 %v481_v44 }
  0x1b   :  { %483 = vmatprep.subr.bf16.mxu0 %v523_v3 }
  0x1d   :  { %467 = vmatpush3.bf16.msra.mxu1 %v466_v29 }
  0x1e   :  { %468 = vmatprep.subr.bf16.mxu1 %v523_v3  ;;  %485 = vmatpush3.bf16.msra.mxu0 %v484_v47 }
  0x1f   :  { %486 = vmatprep.subr.bf16.mxu0 %v523_v3 }
  0x21   :  { %470 = vmatpush3.bf16.msra.mxu1 %v469_v32 }
  0x22   :  { %488 = vmatpush3.bf16.msra.mxu0 %v487_v50 }
  0x23   :  { %489 = vmatprep.subr.bf16.mxu0 %v523_v3 }
  0x26   :  { %491 = vmatpush3.bf16.msra.mxu0 %v490_v53 }
  0x27   :  { %492 = vmatprep.subr.bf16.mxu0 %v523_v3  ;;  %v320_v3 = vld [vmem:[%s726_s6] ss:$0 sm:$0xff] }
  0x2a   :  { %494 = vmatpush3.bf16.msra.mxu0 %v493_v61 }
  0xde   :  { %v109_v55 = vpop.f32.mrb[0].mxu0 }
  0xdf   :  { %v110_v56 = vadd.f32 %v317_v54, %v109_v55  ;;  %v370_v57 = vpop.f32.mrb[1].mxu0 }
  0xe1   :  { %v113_v58 = vmax.f32 %v110_v56, 0.0 }
  0xe3   :  { %404 = vmatmul.mubr.f32.vlgmr.msra.gmra.mrb[0].mxu1 %v113_v58 }
 0x1b6   :  { %v203_v63 = vpop.f32.mrb[0].mxu1 }
 0x1b7   :  { %v204_v0 = vadd.f32 %v319_v62, %v203_v63  ;;  %v405_v1 = vpop.f32.mrb[1].mxu1 }
 0x1b9   :  { %v207_v2 = vmax.f32 %v204_v0, 0.0 }
 0x1bb   :  { %439 = vmatmul.mubr.f32.vlgmr.msra.gmra.mrb[2].mxu0 %v207_v2 }
 0x28e   :  { %v297_v4 = vpop.f32.mrb[2].mxu0 }
 0x28f   :  { %v298_v5 = vadd.f32 %v320_v3, %v297_v4  ;;  %v440_v6 = vpop.f32.mrb[3].mxu0 }
 0x291   :  { %302 = vst.msk [vmem:[#allocation2] sm:$0xff] %vm301_vm2, %v298_v5 }
 0x292   :  { %510 = shalt.err (!%p507_p4)
}
 0x293   :  { %s511_s29 = scalar_lea.hbm %s727_s7, 128 }
 0x294   :  { %p512_p5 = scmp.ne.s32.totalorder %s727_s7, %s511_s29  ;;  %p515_p6 = scmp.lt.u32.totalorder %s511_s29, %s727_s7 }
 0x296   :  { %p517_p7 = pnand %p515_p6, %p512_p5 }
 0x298   :  { %520 = shalt.err (!%p517_p7)
}
 0x299   :  { %312 = dma.vmem_to_hbm [thread:$0]  %s310_s27, 128, %s727_s7, [#allocation3]  }
 0x29a   :  { %521 = dma.done.wait [#allocation3], 128  }
 0x29b   :  { %522 = vsyncadd [#allocation3], 4294967168 }
 0x29c   :  { %316 = vsyncpa [#allocation3], 1 }

</bundles_post_ra>
